<compile_context>
chip_gen: v7x
topology: tpu7x:2x2x1
jax: 0.10.0
libtpu: 0.0.40
codegen_flags: <defaults>
</compile_context>

<pallas_src>
import functools

import jax
import jax.numpy as jnp
from jax import lax
from jax.experimental import pallas as pl
from jax.experimental.pallas import tpu as pltpu

# Module hyper-parameters (deterministic, from __init__ defaults).
GAMMA_NEG = 4.0
GAMMA_POS = 1.0
CLIP = 0.05
EPS = 1e-8


def _round_up(v, m):
    return ((v + m - 1) // m) * m


def _intpow(base, e):
    """base**e for a small non-negative Python int e via repeated squaring (VPU only)."""
    e = int(e)
    if e == 0:
        return jnp.ones_like(base)
    result = None
    cur = base
    while e:
        if e & 1:
            result = cur if result is None else result * cur
        e >>= 1
        if e:
            cur = cur * cur
    return result


def _asl_kernel(x_ref, y_ref, o_ref, *, block_rows, width, valid, need_mask,
                gamma_neg, gamma_pos, clip, eps, binary_fast_path):
    x = x_ref[...].astype(jnp.float32)
    y = y_ref[...].astype(jnp.float32)

    # Sigmoid in tanh form: one EUP transcendental instead of exp + reciprocal.
    xs_pos = 0.5 * jnp.tanh(0.5 * x) + 0.5
    xs_neg = 1.0 - xs_pos
    # clip (probability shifting) on the negative side, clamp to <= 1
    if clip is not None and clip > 0:
        xs_neg = jnp.minimum(xs_neg + clip, 1.0)

    if binary_fast_path:
        # Exact for y in {0, 1}: select the relevant probability once, one log,
        # and integer powers instead of exp(e*log(base)).
        is_pos = y > 0.5
        prob = jnp.where(is_pos, xs_pos, xs_neg)
        loss = jnp.log(jnp.maximum(prob, eps))
        if gamma_neg > 0 or gamma_pos > 0:
            base = 1.0 - prob  # == 1 - xs_pos*y - xs_neg*(1-y) for binary y
            loss = loss * jnp.where(is_pos,
                                    _intpow(base, gamma_pos),
                                    _intpow(base, gamma_neg))
    else:
        # Generic path (soft labels / non-integer gammas): mirrors PyTorch exactly.
        anti = 1.0 - y
        loss = (y * jnp.log(jnp.maximum(xs_pos, eps))
                + anti * jnp.log(jnp.maximum(xs_neg, eps)))
        if gamma_neg > 0 or gamma_pos > 0:
            xp = xs_pos * y
            xn = xs_neg * anti
            loss = loss * jnp.power(1.0 - xp - xn, gamma_pos * y + gamma_neg * anti)

    if need_mask:
        # Zero out padded / grid-overhang elements.  The where() MUST stay before
        # the reduction and MUST be a select (not a multiply: 0*NaN = NaN).
        i = pl.program_id(0)
        row = i * block_rows + lax.broadcasted_iota(jnp.int32, (block_rows, 1), 0)
        vr, vc = valid // width, valid % width
        if vc == 0:
            mask = row < vr
        else:
            col = lax.broadcasted_iota(jnp.int32, (1, width), 1)
            mask = (row < vr) | ((row == vr) & (col < vc))
        loss = jnp.where(mask, loss, 0.0)

    # Per-tile partial reduction, all pure VPU adds (no XLU cross-lane reduce):
    #   1) fold sublane groups: (block_rows, width) -> (8, width)
    #   2) fold lane groups with vreg-aligned slices: (8, width) -> (8, 128)
    part = loss.reshape(block_rows // 8, 8, width).sum(axis=0)
    ngroups = width // 128
    if ngroups > 1:
        acc = part[:, 0:128]
        for g in range(1, ngroups):
            acc = acc + part[:, g * 128:(g + 1) * 128]
        part = acc
    o_ref[...] = part


def _choose_block_rows(m, width, row_align, target_bytes=4 << 20, max_rows=4096):
    """Row tile: multiple of row_align, ~target_bytes of f32 per input block,
    clamped to the (padded) array, and split >=2 ways for v7x's two TensorCores
    once the problem is big enough to matter."""
    rows = max(row_align, (target_bytes // (4 * width)) // row_align * row_align)
    rows = min(rows, max_rows)
    rows = min(rows, _round_up(m, row_align))
    if m * width * 4 > (1 << 20) and m >= 2 * row_align:
        rows = min(rows, _round_up(-(-m // 2), row_align))
    return int(max(rows, row_align))


def asymmetric_loss_optimized(x, y, *, gamma_neg=GAMMA_NEG, gamma_pos=GAMMA_POS,
                              clip=CLIP, eps=EPS, block_rows=None,
                              assume_binary_targets=None):
    """Returns the scalar loss  -sum(loss)  exactly as the PyTorch module does.

    x: logits [N, C] (any float dtype; bf16 halves HBM read traffic).
    y: targets [N, C] (bool / int / float; bool-int auto-enables the exact
       binary fast path, float targets use the generic path unless
       assume_binary_targets=True is passed explicitly).
    """
    assert x.shape == y.shape and x.ndim == 2
    n, c = x.shape
    total = n * c

    if assume_binary_targets is None:
        assume_binary_targets = (jnp.issubdtype(y.dtype, jnp.integer)
                                 or jnp.issubdtype(y.dtype, jnp.bool_))
    binary_fast_path = (
        bool(assume_binary_targets)
        and float(gamma_pos).is_integer() and gamma_pos >= 0
        and float(gamma_neg).is_integer() and gamma_neg >= 0
    )

    # Sublane alignment so bf16 (16,128) / int8-bool (32,128) tiling is satisfied.
    row_align = 8
    for a in (x, y):
        row_align = max(row_align, 32 // max(1, jnp.dtype(a.dtype).itemsize))

    # Lane-dense layout.  The result is a global sum, so row structure is
    # irrelevant: if (N, C) isn't already lane/sublane aligned, flatten to an
    # (M, width) slab with width a multiple of 128 and mask the tail in-kernel.
    if c % 128 == 0 and n % row_align == 0:
        width, m = c, n
        xw, yw = x, y
    else:
        width = c if c % 128 == 0 else (512 if total >= 4096 else 128)
        m = _round_up(-(-total // width), row_align)
        pad = m * width - total

        def _flat(a):
            f = a.reshape(-1)
            if pad:
                f = jnp.pad(f, (0, pad))
            return f.reshape(m, width)

        xw, yw = _flat(x), _flat(y)

    if block_rows is None:
        block_rows = _choose_block_rows(m, width, row_align)
    else:
        block_rows = max(row_align, (block_rows // row_align) * row_align)
        block_rows = min(block_rows, _round_up(m, row_align))

    num_tiles = -(-m // block_rows)
    need_mask = (m % block_rows != 0) or (m * width != total)

    kernel = functools.partial(
        _asl_kernel,
        block_rows=block_rows, width=width, valid=total, need_mask=need_mask,
        gamma_neg=gamma_neg, gamma_pos=gamma_pos, clip=clip, eps=eps,
        binary_fast_path=binary_fast_path,
    )

    in_bytes = (xw.size * jnp.dtype(xw.dtype).itemsize
                + yw.size * jnp.dtype(yw.dtype).itemsize)
    cost = pl.CostEstimate(
        flops=int(12 * m * width),
        transcendentals=int((2 if binary_fast_path else 4) * m * width),
        bytes_accessed=int(in_bytes + num_tiles * 8 * 128 * 4),
    )

    partials = pl.pallas_call(
        kernel,
        out_shape=jax.ShapeDtypeStruct((num_tiles * 8, 128), jnp.float32),
        grid_spec=pltpu.PrefetchScalarGridSpec(
            num_scalar_prefetch=0,
            grid=(num_tiles,),
            in_specs=[
                pl.BlockSpec((block_rows, width), lambda i: (i, 0)),
                pl.BlockSpec((block_rows, width), lambda i: (i, 0)),
            ],
            out_specs=pl.BlockSpec((8, 128), lambda i: (i, 0)),
        ),
        compiler_params=pltpu.CompilerParams(
            dimension_semantics=("parallel",),       # independent tiles -> both TCs on v7x
            vmem_limit_bytes=48 * 1024 * 1024,       # fits v7x's 64 MiB VMEM with headroom
        ),
        cost_estimate=cost,
    )(xw, yw)

    # Tiny final reduction of the (num_tiles*8, 128) lane-dense partial slab.
    return -jnp.sum(partials)


def _reference(x, y, gamma_neg=GAMMA_NEG, gamma_pos=GAMMA_POS, clip=CLIP, eps=EPS):
    # pure-JAX reference mirroring the PyTorch forward
    x = x.astype(jnp.float32)
    y = y.astype(jnp.float32)
    anti = 1.0 - y
    xs_pos = jax.nn.sigmoid(x)
    xs_neg = jnp.minimum(1.0 - xs_pos + clip, 1.0)
    loss = y * jnp.log(jnp.maximum(xs_pos, eps)) + anti * jnp.log(jnp.maximum(xs_neg, eps))
    w = jnp.power(1.0 - xs_pos * y - xs_neg * anti, gamma_pos * y + gamma_neg * anti)
    return -jnp.sum(loss * w)


if __name__ == "__main__":
    key = jax.random.PRNGKey(0)
    k1, k2, k3, k4 = jax.random.split(key, 4)

    # Check 1: canonical multi-label shape, f32 logits, binarized f32 targets
    # (caller opts in to the exact-for-binary fast path).
    N, C = 32, 128
    x = jax.random.normal(k1, (N, C), dtype=jnp.float32)
    y = (jax.random.uniform(k2, (N, C)) < 0.3).astype(jnp.float32)
    out = jax.block_until_ready(asymmetric_loss_optimized(x, y, assume_binary_targets=True))
    ref = _reference(x, y)
    assert jnp.allclose(out, ref, rtol=2e-4, atol=2e-3), (out, ref)

    # Check 2: bf16 logits + int8 targets and a non-lane-aligned class count
    # (exercises the reduced-byte input path and the lane-dense flatten path).
    N2, C2 = 48, 40
    x2 = jax.random.normal(k3, (N2, C2), dtype=jnp.float32).astype(jnp.bfloat16)
    y2 = (jax.random.uniform(k4, (N2, C2)) < 0.3).astype(jnp.int8)
    out2 = jax.block_until_ready(asymmetric_loss_optimized(x2, y2))
    ref2 = _reference(x2.astype(jnp.float32), y2.astype(jnp.float32))
    assert jnp.allclose(out2, ref2, rtol=2e-4, atol=2e-3), (out2, ref2)

    print("KERNEL_OK")
</pallas_src>

<mosaic_0001>
module attributes {stable_mosaic.version = 11 : i64} {
  func.func @_asl_kernel(%arg0: i32, %arg1: memref<32x128xf32, #tpu.memory_space<vmem>>, %arg2: memref<32x128xf32, #tpu.memory_space<vmem>>, %arg3: memref<8x128xf32, #tpu.memory_space<vmem>>) attributes {dimension_semantics = [#tpu.dimension_semantics<parallel>], iteration_bounds = array<i64: 1>, scalar_prefetch = 0 : i64, scratch_operands = 0 : i64, tpu.core_type = #tpu.core_type<tc>, window_params = [{transform_indices = @transform_0, window_bounds = array<i64: 32, 128>}, {transform_indices = @transform_1, window_bounds = array<i64: 32, 128>}, {transform_indices = @transform_2, window_bounds = array<i64: 8, 128>}]} {
    %c0 = arith.constant 0 : index
    %c0_0 = arith.constant 0 : index
    %0 = vector.load %arg1[%c0, %c0_0] : memref<32x128xf32, #tpu.memory_space<vmem>>, vector<32x128xf32>
    %c0_1 = arith.constant 0 : index
    %c0_2 = arith.constant 0 : index
    %1 = vector.load %arg2[%c0_1, %c0_2] : memref<32x128xf32, #tpu.memory_space<vmem>>, vector<32x128xf32>
    %cst = arith.constant 5.000000e-01 : f32
    %2 = vector.broadcast %cst : f32 to vector<32x128xf32>
    %3 = arith.mulf %2, %0 : vector<32x128xf32>
    %4 = math.tanh %3 : vector<32x128xf32>
    %cst_3 = arith.constant 5.000000e-01 : f32
    %5 = vector.broadcast %cst_3 : f32 to vector<32x128xf32>
    %6 = arith.mulf %5, %4 : vector<32x128xf32>
    %cst_4 = arith.constant 5.000000e-01 : f32
    %7 = vector.broadcast %cst_4 : f32 to vector<32x128xf32>
    %8 = arith.addf %6, %7 : vector<32x128xf32>
    %cst_5 = arith.constant 1.000000e+00 : f32
    %9 = vector.broadcast %cst_5 : f32 to vector<32x128xf32>
    %10 = arith.subf %9, %8 : vector<32x128xf32>
    %cst_6 = arith.constant 5.000000e-02 : f32
    %11 = vector.broadcast %cst_6 : f32 to vector<32x128xf32>
    %12 = arith.addf %10, %11 : vector<32x128xf32>
    %cst_7 = arith.constant 1.000000e+00 : f32
    %13 = vector.broadcast %cst_7 : f32 to vector<32x128xf32>
    %14 = arith.minimumf %12, %13 : vector<32x128xf32>
    %cst_8 = arith.constant 5.000000e-01 : f32
    %15 = vector.broadcast %cst_8 : f32 to vector<32x128xf32>
    %16 = arith.cmpf ogt, %1, %15 : vector<32x128xf32>
    %17 = arith.select %16, %8, %14 : vector<32x128xi1>, vector<32x128xf32>
    %cst_9 = arith.constant 9.99999993E-9 : f32
    %18 = vector.broadcast %cst_9 : f32 to vector<32x128xf32>
    %19 = arith.maximumf %17, %18 : vector<32x128xf32>
    %20 = math.log %19 : vector<32x128xf32>
    %cst_10 = arith.constant 1.000000e+00 : f32
    %21 = vector.broadcast %cst_10 : f32 to vector<32x128xf32>
    %22 = arith.subf %21, %17 : vector<32x128xf32>
    %23 = arith.mulf %22, %22 : vector<32x128xf32>
    %24 = arith.mulf %23, %23 : vector<32x128xf32>
    %25 = arith.select %16, %22, %24 : vector<32x128xi1>, vector<32x128xf32>
    %26 = arith.mulf %20, %25 : vector<32x128xf32>
    %27 = vector.shape_cast %26 : vector<32x128xf32> to vector<4x8x128xf32>
    %cst_11 = arith.constant dense<0.000000e+00> : vector<8x128xf32>
    %28 = vector.multi_reduction <add>, %27, %cst_11 [0] : vector<4x8x128xf32> to vector<8x128xf32>
    %c0_12 = arith.constant 0 : index
    %c0_13 = arith.constant 0 : index
    %29 = vector.load %arg3[%c0_12, %c0_13] : memref<8x128xf32, #tpu.memory_space<vmem>>, vector<8x128xf32>
    tpu.vector_store %arg3[%c0_12, %c0_13], %28 {strides = array<i32>} : memref<8x128xf32, #tpu.memory_space<vmem>>, vector<8x128xf32>,
    return
  }
  func.func @transform_0(%arg0: i32) -> (i32, i32) {
    %c0_i32 = arith.constant 0 : i32
    %c0_i32_0 = arith.constant 0 : i32
    return %arg0, %c0_i32 : i32, i32
  }
  func.func @transform_1(%arg0: i32) -> (i32, i32) {
    %c0_i32 = arith.constant 0 : i32
    %c0_i32_0 = arith.constant 0 : i32
    return %arg0, %c0_i32 : i32, i32
  }
  func.func @transform_2(%arg0: i32) -> (i32, i32) {
    %c0_i32 = arith.constant 0 : i32
    %c0_i32_0 = arith.constant 0 : i32
    return %arg0, %c0_i32 : i32, i32
  }
}

</mosaic_0001>

<bundles_post_ra>
// kernel: tpu_custom_call.1
= control target key start
LH: loop header
LB: loop body
LE: loop exit
PB: predicated region body
PF: predicated region fallthrough
CT: control target
= control target key end

     0   :  { %7 = vsyncpa [#allocation3], 0  ;;  %s293_s0 = inlined_call_operand.hbm [shape: f32[32,128], index: 0, kind: input, shape index: {}]   ;;  %s294_s1 = inlined_call_operand.hbm [shape: f32[32,128], index: 1, kind: input, shape index: {}]   ;;  %s295_s2 = inlined_call_operand.hbm [shape: f32[8,128], index: 2, kind: output, shape index: {}]  }
   0x1   :  { %8 = vsyncpa [#allocation6], 0 }
   0x2   :  { %9 = vsyncpa [#allocation4], 0  ;;  %s229_s9 = smov [#allocation2]   ;;  %s157_s13 = scalar_lea.hbm %s293_s0, 512 }
   0x3   :  { %s15_s10 = sshll.u32 %s229_s9, 4  ;;  %p158_p0 = scmp.ne.s32.totalorder %s293_s0, %s157_s13  ;;  %s16_s10 = int_to_ptr.vmem [resolvable:$true] %s15_s10 }
   0x4   :  { %p161_p1 = scmp.lt.u32.totalorder %s157_s13, %s293_s0 }
   0x6   :  { %p163_p2 = pnand %p161_p1, %p158_p0 }
   0x8   :  { %166 = shalt.err (!%p163_p2)
}
   0x9   :  { %s167_s18 = scalar_lea.vmem %s16_s10, 512  ;;  %p172_p4 = scmp.lt.s32.totalorder %s16_s10, %s16_s10 }
   0xa   :  { %p168_p3 = scmp.ne.s32.totalorder %s16_s10, %s167_s18  ;;  %p173_p5 = scmp.lt.s32.totalorder %s167_s18, %s167_s18 }
   0xc   :  { %p174_p6 = por %p173_p5, %p172_p4 }
   0xe   :  { %p175_p7 = pnand %p174_p6, %p168_p3 }
  0x10   :  { %178 = shalt.err (!%p175_p7)
}
  0x11   :  { %s230_s19 = smov 128   ;;  %s231_s20 = smov 8  }
  0x12   :  { %21 = dma.hbm_to_vmem [thread:$0]  %s293_s0, 512, %s16_s10, [#allocation3], %s230_s19, %s230_s19, %s231_s20  }
  0x13   :  { %s232_s23 = smov [#allocation5]   ;;  %s179_s27 = scalar_lea.hbm %s294_s1, 512 }
  0x14   :  { %s27_s24 = sshll.u32 %s232_s23, 4  ;;  %p180_p8 = scmp.ne.s32.totalorder %s294_s1, %s179_s27  ;;  %s28_s24 = int_to_ptr.vmem [resolvable:$true] %s27_s24 }
  0x15   :  { %p183_p9 = scmp.lt.u32.totalorder %s179_s27, %s294_s1 }
  0x17   :  { %p185_p10 = pnand %p183_p9, %p180_p8 }
  0x19   :  { %188 = shalt.err (!%p185_p10)
}
  0x1a   :  { %s189_s4 = scalar_lea.vmem %s28_s24, 512  ;;  %p194_p12 = scmp.lt.s32.totalorder %s28_s24, %s28_s24 }
  0x1b   :  { %p190_p11 = scmp.ne.s32.totalorder %s28_s24, %s189_s4  ;;  %p195_p13 = scmp.lt.s32.totalorder %s189_s4, %s189_s4 }
  0x1d   :  { %p196_p0 = por %p195_p13, %p194_p12 }
  0x1f   :  { %p197_p1 = pnand %p196_p0, %p190_p11 }
  0x21   :  { %200 = shalt.err (!%p197_p1)
}
  0x22   :  { %33 = dma.hbm_to_vmem [thread:$0]  %s294_s1, 512, %s28_s24, [#allocation6], %s230_s19, %s230_s19, %s231_s20  }
  0x23   :  { %223 = dma.done.wait [#allocation3], 512  }
  0x24   :  { %224 = vsyncadd [#allocation3], 4294966784 }
  0x25   :  { %225 = dma.done.wait [#allocation6], 512  }
  0x26   :  { %226 = vsyncadd [#allocation6], 4294966784  ;;  %v40_v0 = vld [vmem:[#allocation2] sm:$0xff]  ;;  %v41_v1 = vld [vmem:[#allocation2 + $0x8] sm:$0xff]  ;;  %s233_s1 = smov [#allocation7]  }
  0x27   :  { %v42_v2 = vld [vmem:[#allocation2 + $0x10] sm:$0xff]  ;;  %v43_v3 = vld [vmem:[#allocation2 + $0x18] sm:$0xff]  ;;  %v48_v4 = vmul.f32 0.5, %v40_v0  ;;  %v49_v5 = vmul.f32 0.5, %v41_v1  ;;  %v44_v18 = vld [vmem:[#allocation5] sm:$0xff]  ;;  %s126_s6 = sshll.u32 %s233_s1, 4  ;;  %s127_s6 = int_to_ptr.vmem [resolvable:$true] %s126_s6 }
  0x28   :  { %v50_v6 = vmul.f32 0.5, %v42_v2  ;;  %v51_v7 = vmul.f32 0.5, %v43_v3  ;;  %v45_v21 = vld [vmem:[#allocation5 + $0x8] sm:$0xff]  ;;  %v46_v24 = vld [vmem:[#allocation5 + $0x10] sm:$0xff]  ;;  %v47_v27 = vld [vmem:[#allocation5 + $0x18] sm:$0xff]  ;;  %vm76_vm0 = vcmp.gt.f32.partialorder %v44_v18, 0.5  ;;  %p206_p3 = scmp.lt.s32.totalorder %s127_s6, %s127_s6 }
  0x29   :  { %141 = vtanh.f32 %v48_v4  ;;  %vm77_vm1 = vcmp.gt.f32.partialorder %v45_v21, 0.5  ;;  %vm78_vm2 = vcmp.gt.f32.partialorder %v46_v24, 0.5  ;;  %vm79_vm3 = vcmp.gt.f32.partialorder %v47_v27, 0.5  ;;  %s201_s7 = scalar_lea.vmem %s127_s6, 128 }
  0x2a   :  { %143 = vtanh.f32 %v49_v5  ;;  %p202_p2 = scmp.ne.s32.totalorder %s127_s6, %s201_s7  ;;  %p207_p4 = scmp.lt.s32.totalorder %s201_s7, %s201_s7 }
  0x2b   :  { %145 = vtanh.f32 %v50_v6 }
  0x2c   :  { %147 = vtanh.f32 %v51_v7  ;;  %p208_p5 = por %p207_p4, %p206_p3 }
  0x2e   :  { %p209_p6 = pnand %p208_p5, %p202_p2 }
  0x33   :  { %v142_v8 = vpop.eup %141 }
  0x34   :  { %v144_v9 = vpop.eup %143  ;;  %v56_v10 = vmul.f32 0.5, %v142_v8 }
  0x35   :  { %v146_v11 = vpop.eup %145  ;;  %v57_v12 = vmul.f32 0.5, %v144_v9 }
  0x36   :  { %v148_v13 = vpop.eup %147  ;;  %v58_v14 = vmul.f32 0.5, %v146_v11  ;;  %v60_v15 = vadd.f32 0.5, %v56_v10 }
  0x37   :  { %v59_v16 = vmul.f32 0.5, %v148_v13  ;;  %v61_v17 = vadd.f32 0.5, %v57_v12 }
  0x38   :  { %v62_v19 = vadd.f32 0.5, %v58_v14  ;;  %v64_v20 = vsub.f32 1.0, %v60_v15 }
  0x39   :  { %v63_v22 = vadd.f32 0.5, %v59_v16  ;;  %v65_v23 = vsub.f32 1.0, %v61_v17 }
  0x3a   :  { %v66_v25 = vsub.f32 1.0, %v62_v19  ;;  %v68_v26 = vadd.f32 0.05, %v64_v20 }
  0x3b   :  { %v67_v28 = vsub.f32 1.0, %v63_v22  ;;  %v69_v29 = vadd.f32 0.05, %v65_v23 }
  0x3c   :  { %v70_v30 = vadd.f32 0.05, %v66_v25  ;;  %v72_v31 = vmin.f32 %v68_v26, 1.0 }
  0x3d   :  { %v71_v32 = vadd.f32 0.05, %v67_v28  ;;  %v73_v33 = vmin.f32 %v69_v29, 1.0 }
  0x3e   :  { %v74_v34 = vmin.f32 %v70_v30, 1.0  ;;  %v80_v35 = vsel %vm76_vm0, %v60_v15, %v72_v31 }
  0x3f   :  { %v75_v36 = vmin.f32 %v71_v32, 1.0  ;;  %v81_v37 = vsel %vm77_vm1, %v61_v17, %v73_v33  ;;  %v84_v38 = vmax.f32 %v80_v35, 1e-08  ;;  %v96_v39 = vsub.f32 1.0, %v80_v35 }
  0x40   :  { %v82_v40 = vsel %vm78_vm2, %v62_v19, %v74_v34  ;;  %v85_v41 = vmax.f32 %v81_v37, 1e-08  ;;  %v97_v42 = vsub.f32 1.0, %v81_v37 }
  0x41   :  { %v83_v43 = vsel %vm79_vm3, %v63_v22, %v75_v36  ;;  %v86_v44 = vmax.f32 %v82_v40, 1e-08  ;;  %149 = vlog2.f32 %v84_v38  ;;  %v98_v45 = vsub.f32 1.0, %v82_v40 }
  0x42   :  { %v87_v46 = vmax.f32 %v83_v43, 1e-08  ;;  %151 = vlog2.f32 %v85_v41  ;;  %v99_v47 = vsub.f32 1.0, %v83_v43  ;;  %v100_v48 = vmul.f32 %v96_v39, %v96_v39 }
  0x43   :  { %153 = vlog2.f32 %v86_v44  ;;  %v101_v49 = vmul.f32 %v97_v42, %v97_v42  ;;  %v102_v50 = vmul.f32 %v98_v45, %v98_v45 }
  0x44   :  { %155 = vlog2.f32 %v87_v46  ;;  %v103_v51 = vmul.f32 %v99_v47, %v99_v47  ;;  %v104_v52 = vmul.f32 %v100_v48, %v100_v48 }
  0x45   :  { %v105_v53 = vmul.f32 %v101_v49, %v101_v49  ;;  %v106_v54 = vmul.f32 %v102_v50, %v102_v50 }
  0x46   :  { %v107_v55 = vmul.f32 %v103_v51, %v103_v51  ;;  %v108_v57 = vsel %vm76_vm0, %v96_v39, %v104_v52 }
  0x47   :  { %v109_v60 = vsel %vm77_vm1, %v97_v42, %v105_v53  ;;  %v110_v63 = vsel %vm78_vm2, %v98_v45, %v106_v54 }
  0x48   :  { %v111_v2 = vsel %vm79_vm3, %v99_v47, %v107_v55 }
  0x4b   :  { %v150_v56 = vpop.eup %149 }
  0x4c   :  { %v152_v58 = vpop.eup %151  ;;  %v89_v59 = vmul.f32 0.6931472, %v150_v56 }
  0x4d   :  { %v154_v61 = vpop.eup %153  ;;  %v91_v62 = vmul.f32 0.6931472, %v152_v58 }
  0x4e   :  { %v156_v0 = vpop.eup %155  ;;  %v93_v1 = vmul.f32 0.6931472, %v154_v61  ;;  %v112_v3 = vmul.f32 %v108_v57, %v89_v59 }
  0x4f   :  { %v95_v4 = vmul.f32 0.6931472, %v156_v0  ;;  %v113_v5 = vmul.f32 %v109_v60, %v91_v62 }
  0x50   :  { %v114_v6 = vmul.f32 %v110_v63, %v93_v1 }
  0x51   :  { %v115_v7 = vmul.f32 %v111_v2, %v95_v4  ;;  %v116_v8 = vadd.f32 %v113_v5, %v112_v3 }
  0x53   :  { %v117_v9 = vadd.f32 %v116_v8, %v114_v6 }
  0x55   :  { %v118_v10 = vadd.f32 %v117_v9, %v115_v7 }
  0x57   :  { %119 = vst [vmem:[#allocation7] sm:$0xff] %v118_v10 }
  0x58   :  { %212 = shalt.err (!%p209_p6)
}
  0x59   :  { %s213_s10 = scalar_lea.hbm %s295_s2, 128 }
  0x5a   :  { %p214_p7 = scmp.ne.s32.totalorder %s295_s2, %s213_s10  ;;  %p217_p8 = scmp.lt.u32.totalorder %s213_s10, %s295_s2 }
  0x5c   :  { %p219_p9 = pnand %p217_p8, %p214_p7 }
  0x5e   :  { %222 = shalt.err (!%p219_p9)
}
  0x5f   :  { %129 = dma.vmem_to_hbm [thread:$0]  %s127_s6, 128, %s295_s2, [#allocation4]  }
  0x60   :  { %227 = dma.done.wait [#allocation4], 128  }
  0x61   :  { %228 = vsyncadd [#allocation4], 4294967168 }
  0x62   :  { %133 = vsyncpa [#allocation3], 1 }
  0x63   :  { %134 = vsyncpa [#allocation6], 1 }
  0x64   :  { %135 = vsyncpa [#allocation4], 1 }

</bundles_post_ra>
